<compile_context>
chip_gen: v5e
topology: v5e:2x2
jax: 0.10.0
libtpu: 0.0.40
codegen_flags: <defaults>
</compile_context>

<pallas_src>
import functools

import jax
import jax.numpy as jnp
from jax.experimental import pallas as pl
from jax.experimental.pallas import tpu as pltpu


_LANE = 128
_VMEM_BUDGET_BYTES = 24 * 2**20   # conservative: leaves headroom inside v7x's scoped VMEM
_VMEM_LIMIT_BYTES = 32 * 2**20


def _round_up(v, m):
    return (v + m - 1) // m * m


def _choose_tm(n_pad, f_in_pad, hid_pad, out_pad):
    """Largest row-tile (multiple of 128, preferring 256-multiples) fitting the VMEM budget."""
    fixed = (
        2 * n_pad * f_in_pad * 2      # X (bf16, double-buffered)
        + 2 * f_in_pad * hid_pad * 2  # W1
        + 2 * hid_pad * out_pad * 2   # W2
        + 2 * (hid_pad + out_pad) * 4 # biases (f32)
        + n_pad * hid_pad * 2         # H scratch (bf16)
        + n_pad * out_pad * 2         # P scratch (bf16)
    )
    per_row = 2 * n_pad * 2 + 2 * out_pad * 4   # A row tile (bf16) + out row tile (f32), double-buffered
    candidates = list(range(min(n_pad, 1024), 0, -_LANE))
    # Prefer full-MXU 256-multiples (v6e/v7x), then any 128-multiple, largest first.
    for tm in sorted(candidates, key=lambda c: (c % 256 != 0, -c)):
        if n_pad % tm == 0 and fixed + tm * per_row <= _VMEM_BUDGET_BYTES:
            return tm
    return min(n_pad, _LANE)


def _fused_gcn_kernel(a_ref, x_ref, w1_ref, b1_ref, w2_ref, b2_ref,
                      o_ref, h_ref, p_ref, *, tm):
    phase = pl.program_id(0)          # 0: layer 1, 1: layer 2
    t = pl.program_id(1)              # row tile of target nodes
    row0 = pl.multiple_of(t * tm, tm)

    @pl.when(phase == 0)
    def _layer1():
        # Layer 1: (A @ X) @ W1 — contract the N^2 matmul over the smaller (padded) F_in.
        ax = jnp.dot(a_ref[...], x_ref[...], preferred_element_type=jnp.float32)
        h = jnp.dot(ax.astype(jnp.bfloat16), w1_ref[...],
                    preferred_element_type=jnp.float32)
        h = jnp.maximum(h + b1_ref[...], 0.0)
        h_ref[pl.ds(row0, tm), :] = h.astype(h_ref.dtype)
        # Placeholder; every output tile is rewritten in phase 1.
        o_ref[...] = jnp.zeros_like(o_ref)

    @pl.when(phase == 1)
    def _layer2():
        # Layer 2: A @ (H @ W2) — P = H @ W2 computed once, reused by every row tile.
        @pl.when(t == 0)
        def _():
            p_ref[...] = jnp.dot(h_ref[...], w2_ref[...],
                                 preferred_element_type=jnp.float32).astype(p_ref.dtype)
        out = jnp.dot(a_ref[...], p_ref[...],
                      preferred_element_type=jnp.float32) + b2_ref[...]
        o_ref[...] = out.astype(o_ref.dtype)


def gcn_encoder(x, a_hat, params):
    """Fused two-layer GCN: conv2(relu(conv1(x))) in a single Pallas kernel."""
    n, f_in = x.shape
    hid = params["w1"].shape[1]
    out = params["w2"].shape[1]

    n_pad = _round_up(n, _LANE)
    f_in_pad = _round_up(f_in, _LANE)
    hid_pad = _round_up(hid, _LANE)
    out_pad = _round_up(out, _LANE)

    # Zero-padded, bf16 operands (padding contributes exact zeros; sliced off below).
    a_p = jnp.zeros((n_pad, n_pad), jnp.bfloat16).at[:n, :n].set(a_hat.astype(jnp.bfloat16))
    x_p = jnp.zeros((n_pad, f_in_pad), jnp.bfloat16).at[:n, :f_in].set(x.astype(jnp.bfloat16))
    w1_p = jnp.zeros((f_in_pad, hid_pad), jnp.bfloat16).at[:f_in, :hid].set(
        params["w1"].astype(jnp.bfloat16))
    b1_p = jnp.zeros((1, hid_pad), jnp.float32).at[0, :hid].set(params["b1"])
    w2_p = jnp.zeros((hid_pad, out_pad), jnp.bfloat16).at[:hid, :out].set(
        params["w2"].astype(jnp.bfloat16))
    b2_p = jnp.zeros((1, out_pad), jnp.float32).at[0, :out].set(params["b2"])

    tm = _choose_tm(n_pad, f_in_pad, hid_pad, out_pad)
    num_tiles = n_pad // tm
    grid = (2, num_tiles)   # (phase, row tile); tile axis iterates fastest

    flops = (2 * n_pad * n_pad * (f_in_pad + out_pad)
             + 2 * n_pad * (f_in_pad * hid_pad + hid_pad * out_pad))
    bytes_accessed = (2 * a_p.size * 2 + x_p.size * 2 + w1_p.size * 2 + w2_p.size * 2
                      + (b1_p.size + b2_p.size) * 4 + n_pad * out_pad * 4)

    kernel = functools.partial(_fused_gcn_kernel, tm=tm)

    z_pad = pl.pallas_call(
        kernel,
        out_shape=jax.ShapeDtypeStruct((n_pad, out_pad), jnp.float32),
        grid_spec=pltpu.PrefetchScalarGridSpec(
            num_scalar_prefetch=0,
            grid=grid,
            in_specs=[
                pl.BlockSpec((tm, n_pad), lambda p, t: (t, 0)),          # A_hat row tile
                pl.BlockSpec((n_pad, f_in_pad), lambda p, t: (0, 0)),    # X (resident)
                pl.BlockSpec((f_in_pad, hid_pad), lambda p, t: (0, 0)),  # W1
                pl.BlockSpec((1, hid_pad), lambda p, t: (0, 0)),         # b1
                pl.BlockSpec((hid_pad, out_pad), lambda p, t: (0, 0)),   # W2
                pl.BlockSpec((1, out_pad), lambda p, t: (0, 0)),         # b2
            ],
            out_specs=pl.BlockSpec((tm, out_pad), lambda p, t: (t, 0)),
            scratch_shapes=[
                pltpu.VMEM((n_pad, hid_pad), jnp.bfloat16),   # H = relu(conv1)
                pltpu.VMEM((n_pad, out_pad), jnp.bfloat16),   # P = H @ W2
            ],
        ),
        compiler_params=pltpu.CompilerParams(
            # Phase 1 depends on all phase-0 tiles via the H scratch -> sequential grid.
            dimension_semantics=("arbitrary", "arbitrary"),
            vmem_limit_bytes=_VMEM_LIMIT_BYTES,
        ),
        cost_estimate=pl.CostEstimate(
            flops=flops, transcendentals=0, bytes_accessed=bytes_accessed),
    )(a_p, x_p, w1_p, b1_p, w2_p, b2_p)

    return z_pad[:n, :out]


def normalized_adjacency(edge_index, num_nodes):
    """Dense D^{-1/2} (A + I) D^{-1/2}, matching PyG gcn_norm (add_self_loops=True)."""
    src = edge_index[0]
    dst = edge_index[1]
    a = jnp.zeros((num_nodes, num_nodes), jnp.float32)
    a = a.at[dst, src].add(1.0)                              # A[target, source]
    a = a + jnp.eye(num_nodes, dtype=jnp.float32)            # self-loops (fill=1)
    deg = a.sum(axis=1)                                      # degree on targets
    d_inv_sqrt = jnp.where(deg > 0.0, 1.0 / jnp.sqrt(deg), 0.0)
    return d_inv_sqrt[:, None] * a * d_inv_sqrt[None, :]


def gcn_reference(x, a_hat, params):
    """Pure-JAX f32 reference for correctness checking."""
    h = jnp.maximum(a_hat @ (x @ params["w1"]) + params["b1"], 0.0)
    return a_hat @ (h @ params["w2"]) + params["b2"]


def glorot(key, fan_in, fan_out):
    bound = jnp.sqrt(6.0 / (fan_in + fan_out))
    return jax.random.uniform(key, (fan_in, fan_out), jnp.float32, -bound, bound)


if __name__ == "__main__":
    N = 32              # number of graph nodes
    IN_CH = 16
    HIDDEN_CH = 32
    OUT_CH = 16
    E = 64              # directed edges before symmetrization

    key = jax.random.PRNGKey(0)
    kx, ks, kd, kw1, kw2 = jax.random.split(key, 5)

    # Node features
    x = jax.random.normal(kx, (N, IN_CH), jnp.float32)

    # Deterministic synthetic undirected edge set (no self-loops in the raw list)
    src = jax.random.randint(ks, (E,), 0, N)
    off = jax.random.randint(kd, (E,), 1, N)
    dst = (src + off) % N
    edge_index = jnp.stack(
        [jnp.concatenate([src, dst]), jnp.concatenate([dst, src])], axis=0
    ).astype(jnp.int32)  # shape (2, 2E)

    # Deterministic parameters (GCNConv: glorot weights, zero bias)
    params = {
        "w1": glorot(kw1, IN_CH, HIDDEN_CH),
        "b1": jnp.zeros((HIDDEN_CH,), jnp.float32),
        "w2": glorot(kw2, HIDDEN_CH, OUT_CH),
        "b2": jnp.zeros((OUT_CH,), jnp.float32),
    }

    a_hat = normalized_adjacency(edge_index, N)

    z = jax.jit(gcn_encoder)(x, a_hat, params)
    jax.block_until_ready(z)

    assert z.shape == (N, OUT_CH) and z.dtype == jnp.float32

    # bf16 operands / f32 accumulation vs. pure-f32 reference -> ~1e-2 tolerance.
    z_ref = gcn_reference(x, a_hat, params)
    assert jnp.allclose(z, z_ref, atol=5e-2, rtol=5e-2), (
        float(jnp.max(jnp.abs(z - z_ref))))

    print("KERNEL_OK")
</pallas_src>

<mosaic_0001>
module attributes {stable_mosaic.version = 11 : i64} {
  func.func @_fused_gcn_kernel(%arg0: i32, %arg1: i32, %arg2: memref<128x128xbf16, #tpu.memory_space<vmem>>, %arg3: memref<128x128xbf16, #tpu.memory_space<vmem>>, %arg4: memref<128x128xbf16, #tpu.memory_space<vmem>>, %arg5: memref<1x128xf32, #tpu.memory_space<vmem>>, %arg6: memref<128x128xbf16, #tpu.memory_space<vmem>>, %arg7: memref<1x128xf32, #tpu.memory_space<vmem>>, %arg8: memref<128x128xf32, #tpu.memory_space<vmem>>, %arg9: memref<128x128xbf16, #tpu.memory_space<vmem>>, %arg10: memref<128x128xbf16, #tpu.memory_space<vmem>>) attributes {dimension_semantics = [#tpu.dimension_semantics<arbitrary>, #tpu.dimension_semantics<arbitrary>], iteration_bounds = array<i64: 2, 1>, scalar_prefetch = 0 : i64, scratch_operands = 2 : i64, tpu.core_type = #tpu.core_type<tc>, window_params = [{transform_indices = @transform_0, window_bounds = array<i64: 128, 128>}, {pipeline_mode = #tpu.pipeline_mode<synchronous>, transform_indices = @transform_1, window_bounds = array<i64: 128, 128>}, {pipeline_mode = #tpu.pipeline_mode<synchronous>, transform_indices = @transform_2, window_bounds = array<i64: 128, 128>}, {pipeline_mode = #tpu.pipeline_mode<synchronous>, transform_indices = @transform_3, window_bounds = array<i64: 1, 128>}, {pipeline_mode = #tpu.pipeline_mode<synchronous>, transform_indices = @transform_4, window_bounds = array<i64: 128, 128>}, {pipeline_mode = #tpu.pipeline_mode<synchronous>, transform_indices = @transform_5, window_bounds = array<i64: 1, 128>}, {transform_indices = @transform_6, window_bounds = array<i64: 128, 128>}]} {
    %c128_i32 = arith.constant 128 : i32
    %0 = arith.muli %arg1, %c128_i32 : i32
    %1 = tpu.assume_multiple %0, 128 : i32
    %c0_i32 = arith.constant 0 : i32
    %2 = arith.cmpi eq, %arg0, %c0_i32 : i32
    %3 = arith.extui %2 : i1 to i32
    %c0_i32_0 = arith.constant 0 : i32
    %4 = arith.cmpi ne, %3, %c0_i32_0 : i32
    scf.if %4 {
      %c0 = arith.constant 0 : index
      %c0_2 = arith.constant 0 : index
      %8 = vector.load %arg2[%c0, %c0_2] : memref<128x128xbf16, #tpu.memory_space<vmem>>, vector<128x128xbf16>
      %c0_3 = arith.constant 0 : index
      %c0_4 = arith.constant 0 : index
      %9 = vector.load %arg3[%c0_3, %c0_4] : memref<128x128xbf16, #tpu.memory_space<vmem>>, vector<128x128xbf16>
      %cst = arith.constant dense<0.000000e+00> : vector<128x128xf32>
      %10 = tpu.matmul %8, %9, %cst {dimension_numbers = #tpu.dot_dimension_numbers<[1], [0], [0], [1], [0, 0, 1, 1], [], []>} : vector<128x128xbf16>, vector<128x128xbf16>, vector<128x128xf32> -> vector<128x128xf32>
      %11 = arith.truncf %10 : vector<128x128xf32> to vector<128x128xbf16>
      %c0_5 = arith.constant 0 : index
      %c0_6 = arith.constant 0 : index
      %12 = vector.load %arg4[%c0_5, %c0_6] : memref<128x128xbf16, #tpu.memory_space<vmem>>, vector<128x128xbf16>
      %cst_7 = arith.constant dense<0.000000e+00> : vector<128x128xf32>
      %13 = tpu.matmul %11, %12, %cst_7 {dimension_numbers = #tpu.dot_dimension_numbers<[1], [0], [0], [1], [0, 0, 1, 1], [], []>} : vector<128x128xbf16>, vector<128x128xbf16>, vector<128x128xf32> -> vector<128x128xf32>
      %c0_8 = arith.constant 0 : index
      %c0_9 = arith.constant 0 : index
      %14 = vector.load %arg5[%c0_8, %c0_9] : memref<1x128xf32, #tpu.memory_space<vmem>>, vector<1x128xf32>
      %15 = vector.broadcast %14 : vector<1x128xf32> to vector<128x128xf32>
      %16 = arith.addf %13, %15 : vector<128x128xf32>
      %cst_10 = arith.constant 0.000000e+00 : f32
      %17 = vector.broadcast %cst_10 : f32 to vector<128x128xf32>
      %18 = arith.maximumf %16, %17 : vector<128x128xf32>
      %19 = arith.truncf %18 : vector<128x128xf32> to vector<128x128xbf16>
      %20 = arith.index_cast %1 : i32 to index
      %c0_11 = arith.constant 0 : index
      %21 = vector.load %arg9[%20, %c0_11] : memref<128x128xbf16, #tpu.memory_space<vmem>>, vector<128x128xbf16>
      tpu.vector_store %arg9[%20, %c0_11], %19 {strides = array<i32>} : memref<128x128xbf16, #tpu.memory_space<vmem>>, vector<128x128xbf16>,
      %cst_12 = arith.constant 0.000000e+00 : f32
      %22 = vector.broadcast %cst_12 : f32 to vector<128x128xf32>
      %c0_13 = arith.constant 0 : index
      %c0_14 = arith.constant 0 : index
      %23 = vector.load %arg8[%c0_13, %c0_14] : memref<128x128xf32, #tpu.memory_space<vmem>>, vector<128x128xf32>
      tpu.vector_store %arg8[%c0_13, %c0_14], %22 {strides = array<i32>} : memref<128x128xf32, #tpu.memory_space<vmem>>, vector<128x128xf32>,
    } else {
    }
    %c1_i32 = arith.constant 1 : i32
    %5 = arith.cmpi eq, %arg0, %c1_i32 : i32
    %6 = arith.extui %5 : i1 to i32
    %c0_i32_1 = arith.constant 0 : i32
    %7 = arith.cmpi ne, %6, %c0_i32_1 : i32
    scf.if %7 {
      %c0_i32_2 = arith.constant 0 : i32
      %8 = arith.cmpi eq, %arg1, %c0_i32_2 : i32
      %9 = arith.extui %8 : i1 to i32
      %c0_i32_3 = arith.constant 0 : i32
      %10 = arith.cmpi ne, %9, %c0_i32_3 : i32
      scf.if %10 {
        %c0_11 = arith.constant 0 : index
        %c0_12 = arith.constant 0 : index
        %18 = vector.load %arg9[%c0_11, %c0_12] : memref<128x128xbf16, #tpu.memory_space<vmem>>, vector<128x128xbf16>
        %c0_13 = arith.constant 0 : index
        %c0_14 = arith.constant 0 : index
        %19 = vector.load %arg6[%c0_13, %c0_14] : memref<128x128xbf16, #tpu.memory_space<vmem>>, vector<128x128xbf16>
        %cst_15 = arith.constant dense<0.000000e+00> : vector<128x128xf32>
        %20 = tpu.matmul %18, %19, %cst_15 {dimension_numbers = #tpu.dot_dimension_numbers<[1], [0], [0], [1], [0, 0, 1, 1], [], []>} : vector<128x128xbf16>, vector<128x128xbf16>, vector<128x128xf32> -> vector<128x128xf32>
        %21 = arith.truncf %20 : vector<128x128xf32> to vector<128x128xbf16>
        %c0_16 = arith.constant 0 : index
        %c0_17 = arith.constant 0 : index
        %22 = vector.load %arg10[%c0_16, %c0_17] : memref<128x128xbf16, #tpu.memory_space<vmem>>, vector<128x128xbf16>
        tpu.vector_store %arg10[%c0_16, %c0_17], %21 {strides = array<i32>} : memref<128x128xbf16, #tpu.memory_space<vmem>>, vector<128x128xbf16>,
      } else {
      }
      %c0 = arith.constant 0 : index
      %c0_4 = arith.constant 0 : index
      %11 = vector.load %arg2[%c0, %c0_4] : memref<128x128xbf16, #tpu.memory_space<vmem>>, vector<128x128xbf16>
      %c0_5 = arith.constant 0 : index
      %c0_6 = arith.constant 0 : index
      %12 = vector.load %arg10[%c0_5, %c0_6] : memref<128x128xbf16, #tpu.memory_space<vmem>>, vector<128x128xbf16>
      %cst = arith.constant dense<0.000000e+00> : vector<128x128xf32>
      %13 = tpu.matmul %11, %12, %cst {dimension_numbers = #tpu.dot_dimension_numbers<[1], [0], [0], [1], [0, 0, 1, 1], [], []>} : vector<128x128xbf16>, vector<128x128xbf16>, vector<128x128xf32> -> vector<128x128xf32>
      %c0_7 = arith.constant 0 : index
      %c0_8 = arith.constant 0 : index
      %14 = vector.load %arg7[%c0_7, %c0_8] : memref<1x128xf32, #tpu.memory_space<vmem>>, vector<1x128xf32>
      %15 = vector.broadcast %14 : vector<1x128xf32> to vector<128x128xf32>
      %16 = arith.addf %13, %15 : vector<128x128xf32>
      %c0_9 = arith.constant 0 : index
      %c0_10 = arith.constant 0 : index
      %17 = vector.load %arg8[%c0_9, %c0_10] : memref<128x128xf32, #tpu.memory_space<vmem>>, vector<128x128xf32>
      tpu.vector_store %arg8[%c0_9, %c0_10], %16 {strides = array<i32>} : memref<128x128xf32, #tpu.memory_space<vmem>>, vector<128x128xf32>,
    } else {
    }
    return
  }
  func.func @transform_0(%arg0: i32, %arg1: i32) -> (i32, i32) {
    %c0_i32 = arith.constant 0 : i32
    %c0_i32_0 = arith.constant 0 : i32
    return %arg1, %c0_i32 : i32, i32
  }
  func.func @transform_1(%arg0: i32, %arg1: i32) -> (i32, i32) {
    %c0_i32 = arith.constant 0 : i32
    %c0_i32_0 = arith.constant 0 : i32
    %c0_i32_1 = arith.constant 0 : i32
    return %c0_i32, %c0_i32_0 : i32, i32
  }
  func.func @transform_2(%arg0: i32, %arg1: i32) -> (i32, i32) {
    %c0_i32 = arith.constant 0 : i32
    %c0_i32_0 = arith.constant 0 : i32
    %c0_i32_1 = arith.constant 0 : i32
    return %c0_i32, %c0_i32_0 : i32, i32
  }
  func.func @transform_3(%arg0: i32, %arg1: i32) -> (i32, i32) {
    %c0_i32 = arith.constant 0 : i32
    %c0_i32_0 = arith.constant 0 : i32
    %c0_i32_1 = arith.constant 0 : i32
    return %c0_i32, %c0_i32_0 : i32, i32
  }
  func.func @transform_4(%arg0: i32, %arg1: i32) -> (i32, i32) {
    %c0_i32 = arith.constant 0 : i32
    %c0_i32_0 = arith.constant 0 : i32
    %c0_i32_1 = arith.constant 0 : i32
    return %c0_i32, %c0_i32_0 : i32, i32
  }
  func.func @transform_5(%arg0: i32, %arg1: i32) -> (i32, i32) {
    %c0_i32 = arith.constant 0 : i32
    %c0_i32_0 = arith.constant 0 : i32
    %c0_i32_1 = arith.constant 0 : i32
    return %c0_i32, %c0_i32_0 : i32, i32
  }
  func.func @transform_6(%arg0: i32, %arg1: i32) -> (i32, i32) {
    %c0_i32 = arith.constant 0 : i32
    %c0_i32_0 = arith.constant 0 : i32
    return %arg1, %c0_i32 : i32, i32
  }
}

</mosaic_0001>

<bundles_post_ra>
// kernel: gcn_encoder.1
= control target key start
LH: loop header
LB: loop body
LE: loop exit
PB: predicated region body
PF: predicated region fallthrough
CT: control target
= control target key end

     0   :  { %s1626_s21 = smov 0   ;;  %s1628_s22 = smov 0   ;;  %s1897_s0 = inlined_call_operand.vmem [shape: bf16[128,128], index: 0, kind: input, shape index: {}]   ;;  %s1898_s1 = inlined_call_operand.vmem [shape: bf16[128,128], index: 1, kind: input, shape index: {}]   ;;  %s1899_s2 = inlined_call_operand.vmem [shape: bf16[128,128], index: 2, kind: input, shape index: {}]   ;;  %s1900_s3 = inlined_call_operand.vmem [shape: f32[1,128], index: 3, kind: input, shape index: {}]   ;;  %s1901_s4 = inlined_call_operand.vmem [shape: bf16[128,128], index: 4, kind: input, shape index: {}]   ;;  %s1902_s5 = inlined_call_operand.vmem [shape: f32[1,128], index: 5, kind: input, shape index: {}]   ;;  %s1903_s6 = inlined_call_operand.vmem [shape: f32[128,128], index: 6, kind: output, shape index: {}]  }
   0x1   :  { %s1630_s23 = smov 0  }
   0x2 LB: > { %s28_s24 = sadd.s32 1, %s1584_s22  ;;  %p1126_p0 = scmp.ge.s32.totalorder %s1588_s23, 1  ;;  %s1588_s23 = sphi %s1630_s23, %s16_s23   ;;  %s1584_s22 = sphi %s1628_s22, %s1905_s22   ;;  %s1580_s21 = sphi %s1626_s21, %s1904_s21  }
   0x3   : > { %p30_p1 = scmp.ge.s32.totalorder %s28_s24, 2  ;;  %p225_p2 = scmp.lt.s32.totalorder %s1588_s23, 3 }
   0x5   : > { %s1907_s24 = smov (%p30_p1, %s28_s24), 0  ;;  %p226_p3 = pnand %p1126_p0, %p225_p2 }
   0x6   : > { %p1127_p4 = scmp.ne.s32.totalorder (!%p226_p3), %s1580_s21, 0 }
   0x7   : > { %229 = sbr.rel (%p226_p3) target bundleno = 845 (0x34d), region = 44 }
   0xc   : > { %271 = sbr.rel (%p1127_p4) target bundleno = 386 (0x182), region = 48 }
  0x11   : > { %v1372_v0 = vld [vmem:[%s1898_s1 + $0x38] sm:$0xff]  ;;  %v1371_v1 = vld [vmem:[%s1898_s1 + $0x30] sm:$0xff]  ;;  %v1370_v2 = vld [vmem:[%s1898_s1 + $0x28] sm:$0xff] }
  0x12   : > { %400 = vmatpush.bf16.msra.mxu0 %v1372_v0  ;;  %1507 = vmatpush.bf16.msra.mxu2 %v1372_v0  ;;  %v1369_v3 = vld [vmem:[%s1898_s1 + $0x20] sm:$0xff]  ;;  %v1368_v4 = vld [vmem:[%s1898_s1 + $0x18] sm:$0xff]  ;;  %v1367_v5 = vld [vmem:[%s1898_s1 + $0x10] sm:$0xff] }
  0x13   : > { %v1366_v6 = vld [vmem:[%s1898_s1 + $0x8] sm:$0xff]  ;;  %v1365_v7 = vld [vmem:[%s1898_s1] sm:$0xff]  ;;  %v1380_v12 = vld [vmem:[%s1899_s2 + $0x38] sm:$0xff] }
  0x14   : > { %v1357_v8 = vld [vmem:[%s1897_s0] sm:$0xff]  ;;  %v1358_v10 = vld [vmem:[%s1897_s0 + $0x8] sm:$0xff]  ;;  %525 = vmatpush.bf16.msra.mxu1 %v1380_v12  ;;  %v1379_v13 = vld [vmem:[%s1899_s2 + $0x30] sm:$0xff]  ;;  %1515 = vmatpush.bf16.msra.mxu3 %v1380_v12 }
  0x15   : > { %v1361_v9 = vld [vmem:[%s1897_s0 + $0x20] sm:$0xff]  ;;  %v1362_v11 = vld [vmem:[%s1897_s0 + $0x28] sm:$0xff]  ;;  %v1359_v16 = vld [vmem:[%s1897_s0 + $0x10] sm:$0xff] }
  0x16   : > { %401 = vmatpush.bf16.msra.mxu0 %v1371_v1  ;;  %1508 = vmatpush.bf16.msra.mxu2 %v1371_v1  ;;  %v1378_v14 = vld [vmem:[%s1899_s2 + $0x28] sm:$0xff]  ;;  %v1377_v15 = vld [vmem:[%s1899_s2 + $0x20] sm:$0xff]  ;;  %v1363_v17 = vld [vmem:[%s1897_s0 + $0x30] sm:$0xff] }
  0x17   : > { %v1376_v18 = vld [vmem:[%s1899_s2 + $0x18] sm:$0xff]  ;;  %v1375_v21 = vld [vmem:[%s1899_s2 + $0x10] sm:$0xff]  ;;  %v1374_v22 = vld [vmem:[%s1899_s2 + $0x8] sm:$0xff] }
  0x18   : > { %526 = vmatpush.bf16.msra.mxu1 %v1379_v13  ;;  %1516 = vmatpush.bf16.msra.mxu3 %v1379_v13  ;;  %v1360_v19 = vld [vmem:[%s1897_s0 + $0x18] sm:$0xff]  ;;  %v1373_v23 = vld [vmem:[%s1899_s2] sm:$0xff] }
  0x19   : > { %v1364_v20 = vld [vmem:[%s1897_s0 + $0x38] sm:$0xff]  ;;  %v1722_v49 = vld [vmem:[%s1900_s3] ss:$0 sm:$0xff] }
  0x1a   : > { %402 = vmatpush.bf16.msra.mxu0 %v1370_v2  ;;  %1509 = vmatpush.bf16.msra.mxu2 %v1370_v2 }
  0x1c   : > { %527 = vmatpush.bf16.msra.mxu1 %v1378_v14  ;;  %1517 = vmatpush.bf16.msra.mxu3 %v1378_v14 }
  0x1e   : > { %403 = vmatpush.bf16.msra.mxu0 %v1369_v3  ;;  %1510 = vmatpush.bf16.msra.mxu2 %v1369_v3 }
  0x20   : > { %528 = vmatpush.bf16.msra.mxu1 %v1377_v15  ;;  %1518 = vmatpush.bf16.msra.mxu3 %v1377_v15 }
  0x22   : > { %404 = vmatpush.bf16.msra.mxu0 %v1368_v4  ;;  %1511 = vmatpush.bf16.msra.mxu2 %v1368_v4 }
  0x24   : > { %529 = vmatpush.bf16.msra.mxu1 %v1376_v18  ;;  %1519 = vmatpush.bf16.msra.mxu3 %v1376_v18 }
  0x26   : > { %405 = vmatpush.bf16.msra.mxu0 %v1367_v5  ;;  %1512 = vmatpush.bf16.msra.mxu2 %v1367_v5 }
  0x28   : > { %530 = vmatpush.bf16.msra.mxu1 %v1375_v21  ;;  %1520 = vmatpush.bf16.msra.mxu3 %v1375_v21 }
  0x2a   : > { %406 = vmatpush.bf16.msra.mxu0 %v1366_v6  ;;  %1513 = vmatpush.bf16.msra.mxu2 %v1366_v6 }
  0x2c   : > { %531 = vmatpush.bf16.msra.mxu1 %v1374_v22  ;;  %1521 = vmatpush.bf16.msra.mxu3 %v1374_v22 }
  0x2e   : > { %407 = vmatpush.bf16.msra.mxu0 %v1365_v7  ;;  %1514 = vmatpush.bf16.msra.mxu2 %v1365_v7 }
  0x30   : > { %532 = vmatpush.bf16.msra.mxu1 %v1373_v23  ;;  %1522 = vmatpush.bf16.msra.mxu3 %v1373_v23 }
  0x31   : > { %408 = vmatmul.bf16.vlgmr.msra.gmra.mxu0 %v1357_v8  ;;  %428 = vmatmul.bf16.vlgmr.msra.gmra.mxu2 %v1361_v9 }
  0x41   : > { %413 = vmatmul.bf16.gmra.mxu0 %v1358_v10  ;;  %433 = vmatmul.bf16.gmra.mxu2 %v1362_v11 }
  0x51   : > { %418 = vmatmul.bf16.gmra.mxu0 %v1359_v16  ;;  %438 = vmatmul.bf16.gmra.mxu2 %v1363_v17 }
  0x61   : > { %423 = vmatmul.bf16.gmra.mxu0 %v1360_v19  ;;  %443 = vmatmul.bf16.gmra.mxu2 %v1364_v20  ;;  %v1590_v20 = vmov 0.0  }
  0x62   : > { %626 = vst [vmem:[%s1903_s6] sm:$0xff] %v1590_v20 }
  0x63   : > { %627 = vst [vmem:[%s1903_s6 + $0x8] sm:$0xff] %v1590_v20 }
  0x64   : > { %628 = vst [vmem:[%s1903_s6 + $0x10] sm:$0xff] %v1590_v20 }
  0x65   : > { %629 = vst [vmem:[%s1903_s6 + $0x18] sm:$0xff] %v1590_v20 }
  0x66   : > { %630 = vst [vmem:[%s1903_s6 + $0x20] sm:$0xff] %v1590_v20 }
  0x67   : > { %631 = vst [vmem:[%s1903_s6 + $0x28] sm:$0xff] %v1590_v20 }
  0x68   : > { %632 = vst [vmem:[%s1903_s6 + $0x30] sm:$0xff] %v1590_v20 }
  0x69   : > { %633 = vst [vmem:[%s1903_s6 + $0x38] sm:$0xff] %v1590_v20 }
  0x6a   : > { %634 = vst [vmem:[%s1903_s6 + $0x40] sm:$0xff] %v1590_v20 }
  0x6b   : > { %635 = vst [vmem:[%s1903_s6 + $0x48] sm:$0xff] %v1590_v20 }
  0x6c   : > { %636 = vst [vmem:[%s1903_s6 + $0x50] sm:$0xff] %v1590_v20 }
  0x6d   : > { %637 = vst [vmem:[%s1903_s6 + $0x58] sm:$0xff] %v1590_v20 }
  0x6e   : > { %638 = vst [vmem:[%s1903_s6 + $0x60] sm:$0xff] %v1590_v20 }
  0x6f   : > { %639 = vst [vmem:[%s1903_s6 + $0x68] sm:$0xff] %v1590_v20 }
  0x70   : > { %640 = vst [vmem:[%s1903_s6 + $0x70] sm:$0xff] %v1590_v20 }
  0x71   : > { %641 = vst [vmem:[%s1903_s6 + $0x78] sm:$0xff] %v1590_v20 }
  0xae   : > { %v409_v24 = vpop.f32.mrf.mxu0 }
  0xb4   : > { %v429_v25 = vpop.f32.mrf.mxu2 }
  0xb6   : > { %v411_v26 = vpop.f32.mrf.mxu0 }
  0xb7   : > { %v449_v27 = vpack.c.bf16 %v411_v26, %v409_v24 }
  0xb9   : > { %533 = vmatmul.bf16.vlgmr.msra.gmra.mxu1 %v449_v27 }
  0xbc   : > { %v431_v28 = vpop.f32.mrf.mxu2 }
  0xbd   : > { %v453_v29 = vpack.c.bf16 %v431_v28, %v429_v25 }
  0xbe   : > { %v414_v30 = vpop.f32.mrf.mxu0 }
  0xbf   : > { %553 = vmatmul.bf16.vlgmr.msra.gmra.mxu3 %v453_v29 }
  0xc4   : > { %v434_v31 = vpop.f32.mrf.mxu2 }
  0xc6   : > { %v416_v32 = vpop.f32.mrf.mxu0 }
  0xc7   : > { %v450_v33 = vpack.c.bf16 %v416_v32, %v414_v30 }
  0xc9   : > { %538 = vmatmul.bf16.gmra.mxu1 %v450_v33 }
  0xcc   : > { %v436_v34 = vpop.f32.mrf.mxu2 }
  0xcd   : > { %v454_v35 = vpack.c.bf16 %v436_v34, %v434_v31 }
  0xce   : > { %v419_v36 = vpop.f32.mrf.mxu0 }
  0xcf   : > { %558 = vmatmul.bf16.gmra.mxu3 %v454_v35 }
  0xd4   : > { %v439_v37 = vpop.f32.mrf.mxu2 }
  0xd6   : > { %v421_v38 = vpop.f32.mrf.mxu0 }
  0xd7   : > { %v451_v39 = vpack.c.bf16 %v421_v38, %v419_v36 }
  0xd9   : > { %543 = vmatmul.bf16.gmra.mxu1 %v451_v39 }
  0xdc   : > { %v441_v40 = vpop.f32.mrf.mxu2 }
  0xdd   : > { %v455_v41 = vpack.c.bf16 %v441_v40, %v439_v37 }
  0xde   : > { %v424_v42 = vpop.f32.mrf.mxu0 }
  0xdf   : > { %563 = vmatmul.bf16.gmra.mxu3 %v455_v41 }
  0xe4   : > { %v444_v43 = vpop.f32.mrf.mxu2 }
  0xe6   : > { %v426_v44 = vpop.f32.mrf.mxu0 }
  0xe7   : > { %v452_v45 = vpack.c.bf16 %v426_v44, %v424_v42 }
  0xe9   : > { %548 = vmatmul.bf16.gmra.mxu1 %v452_v45 }
  0xec   : > { %v446_v46 = vpop.f32.mrf.mxu2 }
  0xed   : > { %v456_v47 = vpack.c.bf16 %v446_v46, %v444_v43 }
  0xef   : > { %568 = vmatmul.bf16.gmra.mxu3 %v456_v47 }
 0x136   : > { %v534_v48 = vpop.f32.mrf.mxu1 }
 0x137   : > { %v535_v50 = vadd.f32 %v1722_v49, %v534_v48 }
 0x139   : > { %v574_v53 = vmax.f32 %v535_v50, 0.0 }
 0x13e   : > { %v536_v51 = vpop.f32.mrf.mxu1 }
 0x13f   : > { %v537_v52 = vadd.f32 %v1722_v49, %v536_v51 }
 0x141   : > { %v575_v54 = vmax.f32 %v537_v52, 0.0 }
 0x142   : > { %v554_v55 = vpop.f32.mrf.mxu3 }
 0x143   : > { %v1416_v56 = vpack.c.bf16 %v575_v54, %v574_v53  ;;  %v555_v58 = vadd.f32 %v1722_v49, %v554_v55 }
 0x145   : > { %1417 = vst [vmem:[#allocation2 + $0x30] sm:$0xff] %v1416_v56   ;;  %v582_v61 = vmax.f32 %v555_v58, 0.0 }
 0x146   : > { %v539_v57 = vpop.f32.mrf.mxu1 }
 0x147   : > { %v540_v62 = vadd.f32 %v1722_v49, %v539_v57 }
 0x149   : > { %v576_v3 = vmax.f32 %v540_v62, 0.0 }
 0x14a   : > { %v556_v59 = vpop.f32.mrf.mxu3 }
 0x14b   : > { %v557_v60 = vadd.f32 %v1722_v49, %v556_v59 }
 0x14d   : > { %v583_v63 = vmax.f32 %v557_v60, 0.0 }
 0x14e   : > { %v541_v0 = vpop.f32.mrf.mxu1 }
 0x14f   : > { %v1436_v1 = vpack.c.bf16 %v583_v63, %v582_v61  ;;  %v542_v2 = vadd.f32 %v1722_v49, %v541_v0 }
 0x151   : > { %1496 = vst [vmem:[#allocation2 + $0x8] sm:$0xff] %v1436_v1   ;;  %v577_v4 = vmax.f32 %v542_v2, 0.0 }
 0x152   : > { %v559_v5 = vpop.f32.mrf.mxu3 }
 0x153   : > { %v1421_v6 = vpack.c.bf16 %v577_v4, %v576_v3  ;;  %v560_v8 = vadd.f32 %v1722_v49, %v559_v5 }
 0x155   : > { %1493 = vst [vmem:[#allocation2] sm:$0xff] %v1421_v6   ;;  %v584_v11 = vmax.f32 %v560_v8, 0.0 }
 0x156   : > { %v544_v7 = vpop.f32.mrf.mxu1 }
 0x157   : > { %v545_v12 = vadd.f32 %v1722_v49, %v544_v7 }
 0x159   : > { %v578_v17 = vmax.f32 %v545_v12, 0.0 }
 0x15a   : > { %v561_v9 = vpop.f32.mrf.mxu3 }
 0x15b   : > { %v562_v10 = vadd.f32 %v1722_v49, %v561_v9 }
 0x15d   : > { %v585_v13 = vmax.f32 %v562_v10, 0.0 }
 0x15e   : > { %v546_v14 = vpop.f32.mrf.mxu1 }
 0x15f   : > { %v1441_v15 = vpack.c.bf16 %v585_v13, %v584_v11  ;;  %v547_v16 = vadd.f32 %v1722_v49, %v546_v14 }
 0x161   : > { %1497 = vst [vmem:[#allocation2 + $0x20] sm:$0xff] %v1441_v15   ;;  %v579_v18 = vmax.f32 %v547_v16, 0.0 }
 0x162   : > { %v564_v19 = vpop.f32.mrf.mxu3 }
 0x163   : > { %v1426_v21 = vpack.c.bf16 %v579_v18, %v578_v17  ;;  %v565_v23 = vadd.f32 %v1722_v49, %v564_v19 }
 0x165   : > { %1494 = vst [vmem:[#allocation2 + $0x18] sm:$0xff] %v1426_v21   ;;  %v586_v26 = vmax.f32 %v565_v23, 0.0 }
 0x166   : > { %v549_v22 = vpop.f32.mrf.mxu1 }
 0x167   : > { %v550_v27 = vadd.f32 %v1722_v49, %v549_v22 }
 0x169   : > { %v580_v32 = vmax.f32 %v550_v27, 0.0 }
 0x16a   : > { %v566_v24 = vpop.f32.mrf.mxu3 }
 0x16b   : > { %v567_v25 = vadd.f32 %v1722_v49, %v566_v24 }
 0x16d   : > { %v587_v28 = vmax.f32 %v567_v25, 0.0 }
 0x16e   : > { %v551_v29 = vpop.f32.mrf.mxu1 }
 0x16f   : > { %v1446_v30 = vpack.c.bf16 %v587_v28, %v586_v26  ;;  %v552_v31 = vadd.f32 %v1722_v49, %v551_v29 }
 0x171   : > { %1498 = vst [vmem:[#allocation2 + $0x28] sm:$0xff] %v1446_v30   ;;  %v581_v33 = vmax.f32 %v552_v31, 0.0 }
 0x172   : > { %v569_v34 = vpop.f32.mrf.mxu3 }
 0x173   : > { %v1431_v35 = vpack.c.bf16 %v581_v33, %v580_v32  ;;  %v570_v36 = vadd.f32 %v1722_v49, %v569_v34 }
 0x175   : > { %1495 = vst [vmem:[#allocation2 + $0x10] sm:$0xff] %v1431_v35   ;;  %v588_v39 = vmax.f32 %v570_v36, 0.0 }
 0x17a   : > { %v571_v37 = vpop.f32.mrf.mxu3 }
 0x17b   : > { %v572_v38 = vadd.f32 %v1722_v49, %v571_v37 }
 0x17d   : > { %v589_v40 = vmax.f32 %v572_v38, 0.0 }
 0x17f   : > { %v1451_v41 = vpack.c.bf16 %v589_v40, %v588_v39 }
 0x181   : > { %1499 = vst [vmem:[#allocation2 + $0x38] sm:$0xff] %v1451_v41  }
 0x182 PF: > { %p1224_p5 = scmp.ne.s32.totalorder %s1580_s21, 1 }
 0x184   : > { %645 = sbr.rel (%p1224_p5) target bundleno = 845 (0x34d), region = 52 }
 0x189   : > { %v1396_v42 = vld [vmem:[%s1901_s4 + $0x38] sm:$0xff]  ;;  %v1395_v43 = vld [vmem:[%s1901_s4 + $0x30] sm:$0xff]  ;;  %v1394_v44 = vld [vmem:[%s1901_s4 + $0x28] sm:$0xff] }
 0x18a   : > { %1523 = vmatpush.bf16.msra.mxu2 %v1396_v42  ;;  %778 = vmatpush.bf16.msra.mxu0 %v1396_v42  ;;  %v1393_v45 = vld [vmem:[%s1901_s4 + $0x20] sm:$0xff]  ;;  %v1392_v46 = vld [vmem:[%s1901_s4 + $0x18] sm:$0xff]  ;;  %v1391_v47 = vld [vmem:[%s1901_s4 + $0x10] sm:$0xff] }
 0x18b   : > { %v1390_v48 = vld [vmem:[%s1901_s4 + $0x8] sm:$0xff]  ;;  %v1389_v49 = vld [vmem:[%s1901_s4] sm:$0xff]  ;;  %v1381_v51 = vld [vmem:[#allocation2 + $0x30] sm:$0xff] }
 0x18c   : > { %v1385_v50 = vld [vmem:[#allocation2 + $0x8] sm:$0xff]  ;;  %v1386_v52 = vld [vmem:[#allocation2 + $0x20] sm:$0xff]  ;;  %v1383_v55 = vld [vmem:[#allocation2 + $0x18] sm:$0xff] }
 0x18d   : > { %v1382_v53 = vld [vmem:[#allocation2] sm:$0xff]  ;;  %v1387_v54 = vld [vmem:[#allocation2 + $0x28] sm:$0xff]  ;;  %v1388_v56 = vld [vmem:[#allocation2 + $0x38] sm:$0xff] }
 0x18e   : > { %1524 = vmatpush.bf16.msra.mxu2 %v1395_v43  ;;  %779 = vmatpush.bf16.msra.mxu0 %v1395_v43  ;;  %v1384_v57 = vld [vmem:[#allocation2 + $0x10] sm:$0xff]  ;;  %v1397_v26 = vld [vmem:[%s1897_s0] sm:$0xff]  ;;  %v1398_v28 = vld [vmem:[%s1897_s0 + $0x8] sm:$0xff] }
 0x18f   : > { %v1401_v27 = vld [vmem:[%s1897_s0 + $0x20] sm:$0xff]  ;;  %v1402_v29 = vld [vmem:[%s1897_s0 + $0x28] sm:$0xff]  ;;  %v1399_v30 = vld [vmem:[%s1897_s0 + $0x10] sm:$0xff] }
 0x190   : > { %v1403_v31 = vld [vmem:[%s1897_s0 + $0x30] sm:$0xff]  ;;  %v1400_v32 = vld [vmem:[%s1897_s0 + $0x18] sm:$0xff]  ;;  %v1565_v34 = vld [vmem:[%s1902_s5] ss:$0 sm:$0xff] }
 0x191   : > { %v1404_v33 = vld [vmem:[%s1897_s0 + $0x38] sm:$0xff] }
 0x192   : > { %1525 = vmatpush.bf16.msra.mxu2 %v1394_v44  ;;  %780 = vmatpush.bf16.msra.mxu0 %v1394_v44 }
 0x196   : > { %1526 = vmatpush.bf16.msra.mxu2 %v1393_v45  ;;  %781 = vmatpush.bf16.msra.mxu0 %v1393_v45 }
 0x19a   : > { %1527 = vmatpush.bf16.msra.mxu2 %v1392_v46  ;;  %782 = vmatpush.bf16.msra.mxu0 %v1392_v46 }
 0x19e   : > { %1528 = vmatpush.bf16.msra.mxu2 %v1391_v47  ;;  %783 = vmatpush.bf16.msra.mxu0 %v1391_v47 }
 0x1a2   : > { %1529 = vmatpush.bf16.msra.mxu2 %v1390_v48  ;;  %784 = vmatpush.bf16.msra.mxu0 %v1390_v48 }
 0x1a6   : > { %1530 = vmatpush.bf16.msra.mxu2 %v1389_v49  ;;  %785 = vmatpush.bf16.msra.mxu0 %v1389_v49 }
 0x1a9   : > { %806 = vmatmul.bf16.vlgmr.msra.gmra.mxu2 %v1385_v50  ;;  %786 = vmatmul.bf16.vlgmr.msra.gmra.mxu0 %v1381_v51 }
 0x1b9   : > { %811 = vmatmul.bf16.gmra.mxu2 %v1386_v52  ;;  %791 = vmatmul.bf16.gmra.mxu0 %v1382_v53 }
 0x1c9   : > { %816 = vmatmul.bf16.gmra.mxu2 %v1387_v54  ;;  %796 = vmatmul.bf16.gmra.mxu0 %v1383_v55 }
 0x1d9   : > { %821 = vmatmul.bf16.gmra.mxu2 %v1388_v56  ;;  %801 = vmatmul.bf16.gmra.mxu0 %v1384_v57 }
 0x226   : > { %v787_v58 = vpop.f32.mrf.mxu0 }
 0x22c   : > { %v807_v59 = vpop.f32.mrf.mxu2 }
 0x22e   : > { %v789_v60 = vpop.f32.mrf.mxu0 }
 0x22f   : > { %v1456_v61 = vpack.c.bf16 %v789_v60, %v787_v58 }
 0x231   : > { %1457 = vst [vmem:[#allocation3] sm:$0xff] %v1456_v61  }
 0x234   : > { %v809_v62 = vpop.f32.mrf.mxu2 }
 0x235   : > { %v1476_v63 = vpack.c.bf16 %v809_v62, %v807_v59 }
 0x236   : > { %v792_v0 = vpop.f32.mrf.mxu0 }
 0x237   : > { %1503 = vst [vmem:[#allocation3 + $0x28] sm:$0xff] %v1476_v63  }
 0x238   : > { %v1405_v25 = vld [vmem:[#allocation3] sm:$0xff] }
 0x23c   : > { %v812_v1 = vpop.f32.mrf.mxu2 }
 0x23e   : > { %v794_v2 = vpop.f32.mrf.mxu0  ;;  %v1409_v21 = vld [vmem:[#allocation3 + $0x28] sm:$0xff] }
 0x23f   : > { %v1461_v3 = vpack.c.bf16 %v794_v2, %v792_v0 }
 0x241   : > { %1500 = vst [vmem:[#allocation3 + $0x18] sm:$0xff] %v1461_v3  }
 0x244   : > { %v814_v4 = vpop.f32.mrf.mxu2 }
 0x245   : > { %v1481_v5 = vpack.c.bf16 %v814_v4, %v812_v1 }
 0x246   : > { %v797_v6 = vpop.f32.mrf.mxu0 }
 0x247   : > { %1504 = vst [vmem:[#allocation3 + $0x8] sm:$0xff] %v1481_v5  }
 0x248   : > { %v1406_v24 = vld [vmem:[#allocation3 + $0x18] sm:$0xff] }
 0x24c   : > { %v817_v7 = vpop.f32.mrf.mxu2 }
 0x24e   : > { %v799_v8 = vpop.f32.mrf.mxu0  ;;  %v1410_v20 = vld [vmem:[#allocation3 + $0x8] sm:$0xff] }
 0x24f   : > { %v1466_v9 = vpack.c.bf16 %v799_v8, %v797_v6 }
 0x251   : > { %1501 = vst [vmem:[#allocation3 + $0x10] sm:$0xff] %v1466_v9  }
 0x254   : > { %v819_v10 = vpop.f32.mrf.mxu2 }
 0x255   : > { %v1486_v11 = vpack.c.bf16 %v819_v10, %v817_v7 }
 0x256   : > { %v802_v12 = vpop.f32.mrf.mxu0 }
 0x257   : > { %1505 = vst [vmem:[#allocation3 + $0x30] sm:$0xff] %v1486_v11  }
 0x258   : > { %v1407_v23 = vld [vmem:[#allocation3 + $0x10] sm:$0xff] }
 0x25c   : > { %v822_v13 = vpop.f32.mrf.mxu2 }
 0x25e   : > { %v804_v14 = vpop.f32.mrf.mxu0  ;;  %v1411_v19 = vld [vmem:[#allocation3 + $0x30] sm:$0xff] }
 0x25f   : > { %v1471_v15 = vpack.c.bf16 %v804_v14, %v802_v12 }
 0x261   : > { %1502 = vst [vmem:[#allocation3 + $0x20] sm:$0xff] %v1471_v15  }
 0x264   : > { %v824_v16 = vpop.f32.mrf.mxu2 }
 0x265   : > { %v1491_v17 = vpack.c.bf16 %v824_v16, %v822_v13 }
 0x267   : > { %1506 = vst [vmem:[#allocation3 + $0x38] sm:$0xff] %v1491_v17  }
 0x268   : > { %v1408_v22 = vld [vmem:[#allocation3 + $0x20] sm:$0xff] }
 0x26e   : > { %v1412_v18 = vld [vmem:[#allocation3 + $0x38] sm:$0xff] }
 0x26f   : > { %991 = vmatpush.bf16.msra.mxu1 %v1412_v18  ;;  %1531 = vmatpush.bf16.msra.mxu3 %v1412_v18 }
 0x273   : > { %992 = vmatpush.bf16.msra.mxu1 %v1411_v19  ;;  %1532 = vmatpush.bf16.msra.mxu3 %v1411_v19 }
 0x277   : > { %993 = vmatpush.bf16.msra.mxu1 %v1410_v20  ;;  %1533 = vmatpush.bf16.msra.mxu3 %v1410_v20 }
 0x27b   : > { %994 = vmatpush.bf16.msra.mxu1 %v1409_v21  ;;  %1534 = vmatpush.bf16.msra.mxu3 %v1409_v21 }
 0x27f   : > { %995 = vmatpush.bf16.msra.mxu1 %v1408_v22  ;;  %1535 = vmatpush.bf16.msra.mxu3 %v1408_v22 }
 0x283   : > { %996 = vmatpush.bf16.msra.mxu1 %v1407_v23  ;;  %1536 = vmatpush.bf16.msra.mxu3 %v1407_v23 }
 0x287   : > { %997 = vmatpush.bf16.msra.mxu1 %v1406_v24  ;;  %1537 = vmatpush.bf16.msra.mxu3 %v1406_v24 }
 0x28b   : > { %998 = vmatpush.bf16.msra.mxu1 %v1405_v25  ;;  %1538 = vmatpush.bf16.msra.mxu3 %v1405_v25 }
 0x28e   : > { %999 = vmatmul.bf16.vlgmr.msra.gmra.mxu1 %v1397_v26  ;;  %1019 = vmatmul.bf16.vlgmr.msra.gmra.mxu3 %v1401_v27 }
 0x29e   : > { %1004 = vmatmul.bf16.gmra.mxu1 %v1398_v28  ;;  %1024 = vmatmul.bf16.gmra.mxu3 %v1402_v29 }
 0x2ae   : > { %1009 = vmatmul.bf16.gmra.mxu1 %v1399_v30  ;;  %1029 = vmatmul.bf16.gmra.mxu3 %v1403_v31 }
 0x2be   : > { %1014 = vmatmul.bf16.gmra.mxu1 %v1400_v32  ;;  %1034 = vmatmul.bf16.gmra.mxu3 %v1404_v33 }
 0x30b   : > { %v1000_v35 = vpop.f32.mrf.mxu1 }
 0x30c   : > { %v1001_v36 = vadd.f32 %v1565_v34, %v1000_v35 }
 0x30e   : > { %1040 = vst [vmem:[%s1903_s6] sm:$0xff] %v1001_v36 }
 0x311   : > { %v1020_v37 = vpop.f32.mrf.mxu3 }
 0x312   : > { %v1021_v38 = vadd.f32 %v1565_v34, %v1020_v37 }
 0x313   : > { %v1002_v39 = vpop.f32.mrf.mxu1 }
 0x314   : > { %1048 = vst [vmem:[%s1903_s6 + $0x40] sm:$0xff] %v1021_v38  ;;  %v1003_v40 = vadd.f32 %v1565_v34, %v1002_v39 }
 0x316   : > { %1041 = vst [vmem:[%s1903_s6 + $0x8] sm:$0xff] %v1003_v40 }
 0x319   : > { %v1022_v41 = vpop.f32.mrf.mxu3 }
 0x31a   : > { %v1023_v42 = vadd.f32 %v1565_v34, %v1022_v41 }
 0x31b   : > { %v1005_v43 = vpop.f32.mrf.mxu1 }
 0x31c   : > { %1049 = vst [vmem:[%s1903_s6 + $0x48] sm:$0xff] %v1023_v42  ;;  %v1006_v44 = vadd.f32 %v1565_v34, %v1005_v43 }
 0x31e   : > { %1042 = vst [vmem:[%s1903_s6 + $0x10] sm:$0xff] %v1006_v44 }
 0x321   : > { %v1025_v45 = vpop.f32.mrf.mxu3 }
 0x322   : > { %v1026_v46 = vadd.f32 %v1565_v34, %v1025_v45 }
 0x323   : > { %v1007_v47 = vpop.f32.mrf.mxu1 }
 0x324   : > { %1050 = vst [vmem:[%s1903_s6 + $0x50] sm:$0xff] %v1026_v46  ;;  %v1008_v48 = vadd.f32 %v1565_v34, %v1007_v47 }
 0x326   : > { %1043 = vst [vmem:[%s1903_s6 + $0x18] sm:$0xff] %v1008_v48 }
 0x329   : > { %v1027_v49 = vpop.f32.mrf.mxu3 }
 0x32a   : > { %v1028_v50 = vadd.f32 %v1565_v34, %v1027_v49 }
 0x32b   : > { %v1010_v51 = vpop.f32.mrf.mxu1 }
 0x32c   : > { %1051 = vst [vmem:[%s1903_s6 + $0x58] sm:$0xff] %v1028_v50  ;;  %v1011_v52 = vadd.f32 %v1565_v34, %v1010_v51 }
 0x32e   : > { %1044 = vst [vmem:[%s1903_s6 + $0x20] sm:$0xff] %v1011_v52 }
 0x331   : > { %v1030_v53 = vpop.f32.mrf.mxu3 }
 0x332   : > { %v1031_v54 = vadd.f32 %v1565_v34, %v1030_v53 }
 0x333   : > { %v1012_v55 = vpop.f32.mrf.mxu1 }
 0x334   : > { %1052 = vst [vmem:[%s1903_s6 + $0x60] sm:$0xff] %v1031_v54  ;;  %v1013_v56 = vadd.f32 %v1565_v34, %v1012_v55 }
 0x336   : > { %1045 = vst [vmem:[%s1903_s6 + $0x28] sm:$0xff] %v1013_v56 }
 0x339   : > { %v1032_v57 = vpop.f32.mrf.mxu3 }
 0x33a   : > { %v1033_v58 = vadd.f32 %v1565_v34, %v1032_v57 }
 0x33b   : > { %v1015_v59 = vpop.f32.mrf.mxu1 }
 0x33c   : > { %1053 = vst [vmem:[%s1903_s6 + $0x68] sm:$0xff] %v1033_v58  ;;  %v1016_v60 = vadd.f32 %v1565_v34, %v1015_v59 }
 0x33e   : > { %1046 = vst [vmem:[%s1903_s6 + $0x30] sm:$0xff] %v1016_v60 }
 0x341   : > { %v1035_v61 = vpop.f32.mrf.mxu3 }
 0x342   : > { %v1036_v62 = vadd.f32 %v1565_v34, %v1035_v61 }
 0x343   : > { %v1017_v63 = vpop.f32.mrf.mxu1 }
 0x344   : > { %1054 = vst [vmem:[%s1903_s6 + $0x70] sm:$0xff] %v1036_v62  ;;  %v1018_v0 = vadd.f32 %v1565_v34, %v1017_v63 }
 0x346   : > { %1047 = vst [vmem:[%s1903_s6 + $0x38] sm:$0xff] %v1018_v0 }
 0x349   : > { %v1037_v1 = vpop.f32.mrf.mxu3 }
 0x34a   : > { %v1038_v2 = vadd.f32 %v1565_v34, %v1037_v1 }
 0x34c   : > { %1055 = vst [vmem:[%s1903_s6 + $0x78] sm:$0xff] %v1038_v2 }
 0x34d PF: > { %s16_s23 = sadd.s32 1, %s1588_s23   ;;  %s1904_s21 = smov %s1584_s22 }
 0x34e   : > { %p13_p6 = scmp.ge.s32.totalorder %s16_s23, 4   ;;  %s1905_s22 = smov %s1907_s24 }
 0x350   :  { %15 = sbr.rel (!%p13_p6) target bundleno = 2 (0x2), region = 87 }

</bundles_post_ra>
